<compile_context>
chip_gen: v7x
topology: tpu7x:2x2x1
jax: 0.10.0
libtpu: 0.0.40
codegen_flags: <defaults>
</compile_context>

<pallas_src>
import jax
import jax.numpy as jnp
from jax.experimental import pallas as pl
from jax.experimental.pallas import tpu as pltpu


def _round_up(x, mult):
    return ((x + mult - 1) // mult) * mult


# ----------------------------------------------------------------------------
# Kernel 1: full factorization product  P = A @ B.T
#   A tile:  (tm, r)        (lane dim = r, full extent)
#   Bt tile: (r, tn)        (pre-transposed B -> lane-dense along tn)
#   O tile:  (tm, tn)       (lane-dense output, unmasked stores)
# ----------------------------------------------------------------------------
def _matmul_kernel(a_ref, bt_ref, o_ref):
    o_ref[...] = jnp.dot(
        a_ref[...], bt_ref[...], preferred_element_type=jnp.float32
    ).astype(o_ref.dtype)


def factorization_full(A, B, *, tm=512, tn=1024, compute_dtype=None):
    """P = A @ B.T via a (tm, tn)-tiled Pallas matmul.

    compute_dtype: optionally cast A/B (e.g. jnp.bfloat16) before the matmul;
    accumulation stays in float32 via preferred_element_type.
    """
    m, r = A.shape
    n, _ = B.shape
    out_dtype = A.dtype

    # Layout plumbing in the wrapper: present B as (r, n) so the RHS is
    # lane-dense along n and the MXU sees a standard contraction.
    Bt = B.T

    tm = min(tm, _round_up(m, 8))
    tn = min(tn, _round_up(n, 128))
    m_pad = _round_up(m, tm)
    n_pad = _round_up(n, tn)

    A_p = jnp.pad(A, ((0, m_pad - m), (0, 0))) if m_pad != m else A
    Bt_p = jnp.pad(Bt, ((0, 0), (0, n_pad - n))) if n_pad != n else Bt
    if compute_dtype is not None:
        A_p = A_p.astype(compute_dtype)
        Bt_p = Bt_p.astype(compute_dtype)

    out = pl.pallas_call(
        _matmul_kernel,
        out_shape=jax.ShapeDtypeStruct((m_pad, n_pad), out_dtype),
        grid_spec=pltpu.PrefetchScalarGridSpec(
            num_scalar_prefetch=0,
            grid=(m_pad // tm, n_pad // tn),
            in_specs=[
                pl.BlockSpec((tm, r), lambda i, j: (i, 0)),
                pl.BlockSpec((r, tn), lambda i, j: (0, j)),
            ],
            out_specs=pl.BlockSpec((tm, tn), lambda i, j: (i, j)),
        ),
        compiler_params=pltpu.CompilerParams(
            dimension_semantics=("parallel", "parallel")),
    )(A_p, Bt_p)

    if m_pad != m or n_pad != n:
        out = out[:m, :n]
    return out


# ----------------------------------------------------------------------------
# Kernel 2: gathered dot products  P[k] = sum_j A[ids0[k], j] * B[ids1[k], j]
#   Inputs are presented transposed, (r, K): the K axis sits on the lane dim,
#   so the VPU multiply and the (sublane) reduction over r run on fully dense
#   128-wide vregs, and the (1, tk) output slab gets unmasked stores.
# ----------------------------------------------------------------------------
def _rowdot_kernel(at_ref, bt_ref, o_ref):
    # at_ref, bt_ref: (r, tk)  ->  o_ref: (1, tk)
    o_ref[...] = jnp.sum(at_ref[...] * bt_ref[...], axis=0, keepdims=True)


def factorization_ids(A, B, ids0, ids1, *, tk=2048):
    r = A.shape[1]
    K = ids0.shape[0]

    # TODO(synk): move the row gather in-kernel (scalar-prefetch ids into SMEM
    # + HBM->VMEM DMA gather) to avoid materializing the gathered rows in HBM.
    Asub_t = jnp.take(A, ids0, axis=0).T   # (r, K)
    Bsub_t = jnp.take(B, ids1, axis=0).T   # (r, K)

    tk = min(tk, _round_up(K, 128))
    K_pad = _round_up(K, tk)
    if K_pad != K:
        Asub_t = jnp.pad(Asub_t, ((0, 0), (0, K_pad - K)))
        Bsub_t = jnp.pad(Bsub_t, ((0, 0), (0, K_pad - K)))

    out = pl.pallas_call(
        _rowdot_kernel,
        out_shape=jax.ShapeDtypeStruct((1, K_pad), A.dtype),
        grid_spec=pltpu.PrefetchScalarGridSpec(
            num_scalar_prefetch=0,
            grid=(K_pad // tk,),
            in_specs=[
                pl.BlockSpec((r, tk), lambda i: (0, i)),
                pl.BlockSpec((r, tk), lambda i: (0, i)),
            ],
            out_specs=pl.BlockSpec((1, tk), lambda i: (0, i)),
        ),
        compiler_params=pltpu.CompilerParams(
            dimension_semantics=("parallel",)),
    )(Asub_t, Bsub_t)

    return out[0, :K]          # (K,) -- matches torch.sum(..., dim=1)


# ----------------------------------------------------------------------------
# Reference (plain JAX) for verification
# ----------------------------------------------------------------------------
def factorization_ref(A, B, ids=None):
    if ids is not None:
        return jnp.sum(A[ids[0], :] * B[ids[1], :], axis=1)
    return A @ B.T


if __name__ == "__main__":
    key = jax.random.PRNGKey(0)

    # ---------------- small test (exercises n padding, single tile) --------
    m, n, r = 32, 48, 16
    kA, kB, kI = jax.random.split(key, 3)
    A = jax.random.uniform(kA, (m, r), dtype=jnp.float32) * 0.1
    B = jax.random.uniform(kB, (n, r), dtype=jnp.float32) * 0.1

    P_full = jax.block_until_ready(factorization_full(A, B))
    assert P_full.shape == (m, n)
    assert jnp.allclose(P_full, factorization_ref(A, B), atol=1e-5, rtol=1e-5)

    K = 8
    ids0 = jax.random.randint(kI, (K,), 0, m)
    ids1 = jax.random.randint(jax.random.fold_in(kI, 1), (K,), 0, n)
    P_ids = jax.block_until_ready(factorization_ids(A, B, ids0, ids1))
    assert P_ids.shape == (K,)
    assert jnp.allclose(P_ids, factorization_ref(A, B, ids=(ids0, ids1)),
                        atol=1e-5, rtol=1e-5)

    # --------------- multi-tile test (padding + 2-D grid + K tiling) -------
    m2, n2, r2 = 136, 200, 16
    kA2, kB2, kI2 = jax.random.split(jax.random.fold_in(key, 7), 3)
    A2 = jax.random.uniform(kA2, (m2, r2), dtype=jnp.float32) * 0.1
    B2 = jax.random.uniform(kB2, (n2, r2), dtype=jnp.float32) * 0.1

    P2 = jax.block_until_ready(factorization_full(A2, B2, tm=64, tn=128))
    assert P2.shape == (m2, n2)
    assert jnp.allclose(P2, factorization_ref(A2, B2), atol=1e-5, rtol=1e-5)

    K2 = 300
    ids0b = jax.random.randint(kI2, (K2,), 0, m2)
    ids1b = jax.random.randint(jax.random.fold_in(kI2, 1), (K2,), 0, n2)
    P2_ids = jax.block_until_ready(
        factorization_ids(A2, B2, ids0b, ids1b, tk=128))
    assert P2_ids.shape == (K2,)
    assert jnp.allclose(P2_ids, factorization_ref(A2, B2, ids=(ids0b, ids1b)),
                        atol=1e-5, rtol=1e-5)

    print("KERNEL_OK")
</pallas_src>

<mosaic_0001>
module attributes {stable_mosaic.version = 11 : i64} {
  func.func @_matmul_kernel(%arg0: i32, %arg1: i32, %arg2: memref<32x16xf32, #tpu.memory_space<vmem>>, %arg3: memref<16x128xf32, #tpu.memory_space<vmem>>, %arg4: memref<32x128xf32, #tpu.memory_space<vmem>>) attributes {dimension_semantics = [#tpu.dimension_semantics<parallel>, #tpu.dimension_semantics<parallel>], iteration_bounds = array<i64: 1, 1>, scalar_prefetch = 0 : i64, scratch_operands = 0 : i64, tpu.core_type = #tpu.core_type<tc>, window_params = [{transform_indices = @transform_0, window_bounds = array<i64: 32, 16>}, {transform_indices = @transform_1, window_bounds = array<i64: 16, 128>}, {transform_indices = @transform_2, window_bounds = array<i64: 32, 128>}]} {
    %c0 = arith.constant 0 : index
    %c0_0 = arith.constant 0 : index
    %0 = vector.load %arg2[%c0, %c0_0] : memref<32x16xf32, #tpu.memory_space<vmem>>, vector<32x16xf32>
    %c0_1 = arith.constant 0 : index
    %c0_2 = arith.constant 0 : index
    %1 = vector.load %arg3[%c0_1, %c0_2] : memref<16x128xf32, #tpu.memory_space<vmem>>, vector<16x128xf32>
    %cst = arith.constant dense<0.000000e+00> : vector<32x128xf32>
    %2 = tpu.matmul %0, %1, %cst {dimension_numbers = #tpu.dot_dimension_numbers<[1], [0], [0], [1], [0, 0, 1, 1], [], []>} : vector<32x16xf32>, vector<16x128xf32>, vector<32x128xf32> -> vector<32x128xf32>
    %c0_3 = arith.constant 0 : index
    %c0_4 = arith.constant 0 : index
    %3 = vector.load %arg4[%c0_3, %c0_4] : memref<32x128xf32, #tpu.memory_space<vmem>>, vector<32x128xf32>
    tpu.vector_store %arg4[%c0_3, %c0_4], %2 {strides = array<i32>} : memref<32x128xf32, #tpu.memory_space<vmem>>, vector<32x128xf32>,
    return
  }
  func.func @transform_0(%arg0: i32, %arg1: i32) -> (i32, i32) {
    %c0_i32 = arith.constant 0 : i32
    %c0_i32_0 = arith.constant 0 : i32
    return %arg0, %c0_i32 : i32, i32
  }
  func.func @transform_1(%arg0: i32, %arg1: i32) -> (i32, i32) {
    %c0_i32 = arith.constant 0 : i32
    %c0_i32_0 = arith.constant 0 : i32
    return %c0_i32, %arg1 : i32, i32
  }
  func.func @transform_2(%arg0: i32, %arg1: i32) -> (i32, i32) {
    %c0_i32 = arith.constant 0 : i32
    return %arg0, %arg1 : i32, i32
  }
}

</mosaic_0001>

<bundles_post_ra>
// kernel: tpu_custom_call.1
= control target key start
LH: loop header
LB: loop body
LE: loop exit
PB: predicated region body
PF: predicated region fallthrough
CT: control target
= control target key end

     0   :  { %vm18_vm0 = vcmask 130048   ;;  %s237_s0 = inlined_call_operand.vmem [shape: f32[32,16], index: 0, kind: input, shape index: {}]   ;;  %s238_s1 = inlined_call_operand.vmem [shape: f32[16,128], index: 1, kind: input, shape index: {}]   ;;  %s239_s2 = inlined_call_operand.hbm [shape: f32[32,128], index: 2, kind: output, shape index: {}]  }
   0x1   :  { %v16_v0 = vld [vmem:[%s238_s1] sm:$0xff]  ;;  %v17_v1 = vld [vmem:[%s238_s1 + $0x8] sm:$0xff]  ;;  %v14_v4 = vld [vmem:[%s237_s0 + $0x10] sm:$0xff] }
   0x2   :  { %v12_v2 = vld [vmem:[%s237_s0] sm:$0xff]  ;;  %v156_v3 = vpack.c.bf16 %v17_v1, %v16_v0  ;;  %153 = vmatprep.mubr.msk.f32.mxu1 %vm18_vm0, %v14_v4 }
   0x3   :  { %150 = vmatprep.mubr.msk.f32.mxu0 %vm18_vm0, %v12_v2 }
   0x4   :  { %7 = vsyncpa [#allocation3], 0  ;;  %157 = vmatprep.subr.bf16.mxu0 %v156_v3  ;;  %160 = vmatprep.subr.bf16.mxu1 %v156_v3  ;;  %v13_v5 = vld [vmem:[%s237_s0 + $0x8] sm:$0xff]  ;;  %v15_v6 = vld [vmem:[%s237_s0 + $0x18] sm:$0xff]  ;;  %s189_s20 = smov [#allocation2]  }
   0x5   :  { %159 = vmatpush3.bf16.msra.mxu0 %v156_v3  ;;  %161 = vmatpush3.bf16.msra.mxu1 %v156_v3  ;;  %s125_s21 = sshll.u32 %s189_s20, 4  ;;  %s126_s21 = int_to_ptr.vmem [resolvable:$true] %s125_s21 }
   0x6   :  { %s165_s22 = scalar_lea.vmem %s126_s21, 512  ;;  %p170_p1 = scmp.lt.s32.totalorder %s126_s21, %s126_s21 }
   0x7   :  { %p166_p0 = scmp.ne.s32.totalorder %s126_s21, %s165_s22  ;;  %p171_p2 = scmp.lt.s32.totalorder %s165_s22, %s165_s22 }
   0x8   :  { %151 = vmatmul.mubr.msk.f32.vlgmr.msra.gmra.mrb[0].mxu0 %vm18_vm0, %v13_v5  ;;  %154 = vmatmul.mubr.msk.f32.vlgmr.msra.gmra.mrb[0].mxu1 %vm18_vm0, %v15_v6 }
   0x9   :  { %p172_p3 = por %p171_p2, %p170_p1 }
   0xb   :  { %p173_p4 = pnand %p172_p3, %p166_p0 }
  0xdb   :  { %v152_v7 = vpop.f32.mrb[0].mxu0  ;;  %v155_v8 = vpop.f32.mrb[0].mxu1 }
  0xdc   :  { %117 = vst [vmem:[#allocation2 + $0x8] sm:$0xff] %v152_v7  ;;  %119 = vst [vmem:[#allocation2 + $0x18] sm:$0xff] %v155_v8  ;;  %v97_v9 = vpop.f32.mrb[1].mxu0  ;;  %v107_v10 = vpop.f32.mrb[1].mxu1 }
  0xdd   :  { %116 = vst [vmem:[#allocation2] sm:$0xff] %v97_v9  ;;  %118 = vst [vmem:[#allocation2 + $0x10] sm:$0xff] %v107_v10 }
  0xde   :  { %176 = shalt.err (!%p173_p4)
}
  0xdf   :  { %s177_s24 = scalar_lea.hbm %s239_s2, 512 }
  0xe0   :  { %p178_p5 = scmp.ne.s32.totalorder %s239_s2, %s177_s24  ;;  %p181_p6 = scmp.lt.u32.totalorder %s177_s24, %s239_s2 }
  0xe2   :  { %p183_p7 = pnand %p181_p6, %p178_p5 }
  0xe4   :  { %186 = shalt.err (!%p183_p7)
}
  0xe5   :  { %s190_s29 = smov 128   ;;  %s191_s30 = smov 8  }
  0xe6   :  { %131 = dma.vmem_to_hbm [thread:$0]  %s126_s21, 512, %s239_s2, [#allocation3], %s190_s29, %s190_s29, %s191_s30  }
  0xe7   :  { %187 = dma.done.wait [#allocation3], 512  }
  0xe8   :  { %188 = vsyncadd [#allocation3], 4294966784 }
  0xe9   :  { %135 = vsyncpa [#allocation3], 1 }

</bundles_post_ra>
